<compile_context>
chip_gen: v7x
topology: tpu7x:2x2x1
jax: 0.10.0
libtpu: 0.0.40
codegen_flags: <defaults>
</compile_context>

<pallas_src>
import functools

import numpy as np
import jax
import jax.numpy as jnp
from jax import lax
from jax.experimental import pallas as pl
from jax.experimental.pallas import tpu as pltpu


def _silu(v):
    return v * jax.nn.sigmoid(v)


def _full_spec(shape):
    nd = len(shape)
    return pl.BlockSpec(shape, lambda *_, nd=nd: (0,) * nd)


def _make_conv_masks(B, H, W):
    """(9, B*H*W) f32 constant: mask[k, b*H*W + h*W + w] = 1 iff tap k = dy*3 + dx reads
    an in-bounds source pixel (h+dy-1, w+dx-1).  Built host-side with numpy so the kernel
    does no iota / modulo / compare work for the conv halos."""
    N = B * H * W
    col = np.arange(N)
    hh = (col // W) % H
    ww = col % W
    masks = np.ones((9, N), np.float32)
    for dy in range(3):
        for dx in range(3):
            oy, ox = dy - 1, dx - 1
            ok = (hh + oy >= 0) & (hh + oy < H) & (ww + ox >= 0) & (ww + ox < W)
            masks[dy * 3 + dx] = ok.astype(np.float32)
    return jnp.asarray(masks)


def _conv_taps(x, mask, W):
    """x: (C, N=B*H*W) f32 channel-major, columns ordered (b, h, w) b-major.

    Returns (9*C, N) bf16: row (k*C + c), k = dy*3 + dx, holds for every output position
    (b, h, w) the value of channel c at spatial offset (dy-1, dx-1), zeroed outside the
    HxW border.  Shifts are pltpu.roll on the lane axis (XLU, cheap); out-of-bounds taps
    (including any roll that wraps across a batch boundary) are killed by the mask.
    Concatenation happens in f32 (sublane-tile aligned), then one cast to bf16 for MXU.
    """
    C, N = x.shape
    taps = []
    for dy in range(3):
        for dx in range(3):
            k = dy * 3 + dx
            s = (dy - 1) * W + (dx - 1)
            t = x if s == 0 else pltpu.roll(x, shift=(-s) % N, axis=1)
            if k != 4:  # centre tap is always in-bounds
                t = t * mask[k:k + 1, :]
            taps.append(t)
    return jnp.concatenate(taps, axis=0).astype(jnp.bfloat16)


def actor_critic_fused_kernel(x_ref, mask_ref, w1t_ref, b1_ref, w2t_ref, b2_ref,
                              wd_ref, bd_ref, wih_ref, blstm_ref,
                              whead_ref, bhead_ref,
                              logits_ref, value_ref, *, B, C0, H, W):
    HW = H * W
    C2 = w2t_ref.shape[0]
    D = wd_ref.shape[1]
    A = whead_ref.shape[1] - 1

    x2 = x_ref[...]
    mask = mask_ref[...]

    # (B*C0, H*W) -> (C0, B*H*W): lane-dense channel-major columns.
    xc = jnp.concatenate([x2[b * C0:(b + 1) * C0, :] for b in range(B)], axis=1)

    # conv1: one K=9*C0 matmul, lane-dense (C1, B*H*W) output.
    p1 = _conv_taps(xc, mask, W)
    y1 = jnp.dot(w1t_ref[...], p1, preferred_element_type=jnp.float32)
    y1 = _silu(y1 + b1_ref[...])

    # conv2: one K=9*C1 matmul.
    p2 = _conv_taps(y1, mask, W)
    y2 = jnp.dot(w2t_ref[...], p2, preferred_element_type=jnp.float32)
    y2 = _silu(y2 + b2_ref[...])

    # flatten(1) in PyTorch (C, H, W) order: feat[b, c*HW + s] = y2[c, b*HW + s].
    feat = jnp.concatenate(
        [jnp.concatenate([y2[c:c + 1, b * HW:(b + 1) * HW] for b in range(B)], axis=0)
         for c in range(C2)],
        axis=1)                                                    # (B, C2*H*W)

    # dense + SiLU
    xd = jnp.dot(feat.astype(jnp.bfloat16), wd_ref[...],
                 preferred_element_type=jnp.float32) + bd_ref[...]
    xd = _silu(xd)                                                 # (B, D)

    # LSTMCell with zero initial state (right after reset()): h0@whh and f*c0 terms are
    # identically zero and dropped; gate order (i, f, g, o) as in PyTorch.
    # TODO(synk): stateful rnn_state / mask_padding partial updates would need an
    # rnn-state input behind a scalar flag + pl.when; not implemented here.
    gates = jnp.dot(xd.astype(jnp.bfloat16), wih_ref[...],
                    preferred_element_type=jnp.float32) + blstm_ref[...]
    i_g = jax.nn.sigmoid(gates[:, 0:D])
    g_g = jnp.tanh(gates[:, 2 * D:3 * D])
    o_g = jax.nn.sigmoid(gates[:, 3 * D:4 * D])
    h_t = o_g * jnp.tanh(i_g * g_g)                                # (B, D)

    # fused actor + critic heads: one (D, A+1) matmul, then split.
    out = jnp.dot(h_t.astype(jnp.bfloat16), whead_ref[...],
                  preferred_element_type=jnp.float32) + bhead_ref[...]
    logits_ref[...] = out[:, :A]
    value_ref[...] = out[:, A:A + 1]


# --------------------------------- wrapper -----------------------------------------------
def actor_critic_forward(kparams, inputs_nchw):
    """inputs_nchw: (B, token_embed_dim, H, W) f32 -> (logits (B,1,A), values (B,1,1))."""
    B, C0, H, W = inputs_nchw.shape
    A = kparams["whead"].shape[1] - 1

    # Row-major-preserving reshape: zero-cost; no XLA transpose/pad dispatch.
    x2 = inputs_nchw.astype(jnp.float32).reshape(B * C0, H * W)
    mask = _make_conv_masks(B, H, W)   # trace-time constant

    ins = (x2, mask, kparams["w1t"], kparams["b1"], kparams["w2t"], kparams["b2"],
           kparams["wd"], kparams["bd"], kparams["wih"], kparams["blstm"],
           kparams["whead"], kparams["bhead"])

    kernel = functools.partial(actor_critic_fused_kernel, B=B, C0=C0, H=H, W=W)

    # TODO(synk): for large B, add a batch grid axis marked "parallel" (and re-derive the
    # VMEM budget against 64 MiB on v7x); grid=(1,) is fine at these sizes (<1 MiB total).
    logits, values = pl.pallas_call(
        kernel,
        out_shape=(jax.ShapeDtypeStruct((B, A), jnp.float32),
                   jax.ShapeDtypeStruct((B, 1), jnp.float32)),
        grid=(1,),
        in_specs=[_full_spec(a.shape) for a in ins],
        out_specs=(_full_spec((B, A)), _full_spec((B, 1))),
        compiler_params=pltpu.CompilerParams(dimension_semantics=("arbitrary",)),
    )(*ins)

    logits_actions = logits[:, None, :]   # (B, 1, A) == rearrange(..., 'b a -> b 1 a')
    means_values = values[:, None, :]     # (B, 1, 1) == rearrange(..., 'b 1 -> b 1 1')
    return logits_actions, means_values


# --------------------------- deterministic parameter init --------------------------------
def init_params(key, *, act_vocab_size, token_embed_dim, tokens_per_obs, lstm_dim):
    C0 = token_embed_dim
    C1, C2 = C0 // 2, C0 // 4
    in_features = tokens_per_obs * C0 // 4
    ks = jax.random.split(key, 16)

    def nrm(k, shape, fan_in):
        return (jax.random.normal(k, shape, jnp.float32) / np.sqrt(fan_in)).astype(jnp.float32)

    p = {}
    p["w1"] = nrm(ks[0], (9, C0, C1), 9 * C0)     # conv1 taps, (k, cin, cout)
    p["b1"] = nrm(ks[1], (1, C1), 9 * C0)
    p["w2"] = nrm(ks[2], (9, C1, C2), 9 * C1)
    p["b2"] = nrm(ks[3], (1, C2), 9 * C1)
    p["wd"] = nrm(ks[4], (in_features, lstm_dim), in_features)
    p["bd"] = nrm(ks[5], (1, lstm_dim), in_features)
    p["wih"] = nrm(ks[6], (lstm_dim, 4 * lstm_dim), lstm_dim)
    p["bih"] = nrm(ks[7], (1, 4 * lstm_dim), lstm_dim)
    p["whh"] = nrm(ks[8], (lstm_dim, 4 * lstm_dim), lstm_dim)   # unused at zero state
    p["bhh"] = nrm(ks[9], (1, 4 * lstm_dim), lstm_dim)
    p["wa"] = nrm(ks[10], (lstm_dim, act_vocab_size), lstm_dim)
    p["ba"] = nrm(ks[11], (1, act_vocab_size), lstm_dim)
    p["wc"] = nrm(ks[12], (lstm_dim, 1), lstm_dim)
    p["bc"] = nrm(ks[13], (1, 1), lstm_dim)
    return p


def prepare_params(p):
    """One-time re-layout for the fused kernel: transposed conv weights (Cout, 9*Cin),
    bf16 weights, folded LSTM bias, fused actor+critic head.  whh is intentionally
    dropped (multiplied by the zero initial hidden state)."""
    C0, C1 = p["w1"].shape[1], p["w1"].shape[2]
    C2 = p["w2"].shape[2]
    kp = {}
    kp["w1t"] = jnp.transpose(p["w1"], (2, 0, 1)).reshape(C1, 9 * C0).astype(jnp.bfloat16)
    kp["b1"] = p["b1"].reshape(C1, 1).astype(jnp.float32)
    kp["w2t"] = jnp.transpose(p["w2"], (2, 0, 1)).reshape(C2, 9 * C1).astype(jnp.bfloat16)
    kp["b2"] = p["b2"].reshape(C2, 1).astype(jnp.float32)
    kp["wd"] = p["wd"].astype(jnp.bfloat16)
    kp["bd"] = p["bd"].astype(jnp.float32)
    kp["wih"] = p["wih"].astype(jnp.bfloat16)
    kp["blstm"] = (p["bih"] + p["bhh"]).astype(jnp.float32)
    kp["whead"] = jnp.concatenate([p["wa"], p["wc"]], axis=1).astype(jnp.bfloat16)
    kp["bhead"] = jnp.concatenate([p["ba"], p["bc"]], axis=1).astype(jnp.float32)
    return kp


# --------------------------------- pure-JAX reference ------------------------------------
def reference_forward(params, inputs_nchw):
    B, C0, H, W = inputs_nchw.shape
    C1, C2 = C0 // 2, C0 // 4
    D = params["wd"].shape[1]

    def conv(x, w9, b, cin, cout):
        w = w9.reshape(3, 3, cin, cout).transpose(3, 2, 0, 1)  # -> OIHW
        y = lax.conv_general_dilated(x, w, (1, 1), 'SAME',
                                     dimension_numbers=('NCHW', 'OIHW', 'NCHW'))
        y = y + b.reshape(1, cout, 1, 1)
        return y * jax.nn.sigmoid(y)

    x = conv(inputs_nchw, params["w1"], params["b1"], C0, C1)
    x = conv(x, params["w2"], params["b2"], C1, C2)
    x = x.reshape(B, -1)
    x = x @ params["wd"] + params["bd"]
    x = x * jax.nn.sigmoid(x)
    gates = x @ params["wih"] + params["bih"] + params["bhh"]  # h0 = 0
    i = jax.nn.sigmoid(gates[:, :D])
    g = jnp.tanh(gates[:, 2 * D:3 * D])
    o = jax.nn.sigmoid(gates[:, 3 * D:])
    c = i * g  # c0 = 0
    h = o * jnp.tanh(c)
    logits = h @ params["wa"] + params["ba"]
    values = h @ params["wc"] + params["bc"]
    return logits[:, None, :], values[:, None, :]


if __name__ == "__main__":
    B = 2
    token_embed_dim = 16        # C0; conv channels 16 -> 8 -> 4
    H = W = 8                   # tokens_per_obs = 64
    lstm_dim = 128
    act_vocab_size = 6

    key = jax.random.PRNGKey(0)
    pkey, xkey = jax.random.split(key)
    params = init_params(pkey, act_vocab_size=act_vocab_size,
                         token_embed_dim=token_embed_dim,
                         tokens_per_obs=H * W, lstm_dim=lstm_dim)
    kparams = prepare_params(params)
    inputs = jax.random.normal(xkey, (B, token_embed_dim, H, W), jnp.float32)

    fwd = jax.jit(actor_critic_forward)
    logits_actions, means_values = fwd(kparams, inputs)
    (logits_actions, means_values) = jax.block_until_ready((logits_actions, means_values))

    assert logits_actions.shape == (B, 1, act_vocab_size)
    assert means_values.shape == (B, 1, 1)

    ref_logits, ref_values = reference_forward(params, inputs)
    np.testing.assert_allclose(np.asarray(logits_actions), np.asarray(ref_logits),
                               rtol=5e-2, atol=5e-2)
    np.testing.assert_allclose(np.asarray(means_values), np.asarray(ref_values),
                               rtol=5e-2, atol=5e-2)
    print("KERNEL_OK")
</pallas_src>

<mosaic_0001>
module attributes {stable_mosaic.version = 11 : i64} {
  func.func @actor_critic_fused_kernel(%arg0: i32, %arg1: memref<32x64xf32, #tpu.memory_space<vmem>>, %arg2: memref<9x128xf32, #tpu.memory_space<vmem>>, %arg3: memref<8x144xbf16, #tpu.memory_space<vmem>>, %arg4: memref<8x1xf32, #tpu.memory_space<vmem>>, %arg5: memref<4x72xbf16, #tpu.memory_space<vmem>>, %arg6: memref<4x1xf32, #tpu.memory_space<vmem>>, %arg7: memref<256x128xbf16, #tpu.memory_space<vmem>>, %arg8: memref<1x128xf32, #tpu.memory_space<vmem>>, %arg9: memref<128x512xbf16, #tpu.memory_space<vmem>>, %arg10: memref<1x512xf32, #tpu.memory_space<vmem>>, %arg11: memref<128x7xbf16, #tpu.memory_space<vmem>>, %arg12: memref<1x7xf32, #tpu.memory_space<vmem>>, %arg13: memref<2x6xf32, #tpu.memory_space<vmem>>, %arg14: memref<2x1xf32, #tpu.memory_space<vmem>>) attributes {dimension_semantics = [#tpu.dimension_semantics<arbitrary>], iteration_bounds = array<i64: 1>, scalar_prefetch = 0 : i64, scratch_operands = 0 : i64, tpu.core_type = #tpu.core_type<tc>, window_params = [{pipeline_mode = #tpu.pipeline_mode<synchronous>, transform_indices = @transform_0, window_bounds = array<i64: 32, 64>}, {pipeline_mode = #tpu.pipeline_mode<synchronous>, transform_indices = @transform_1, window_bounds = array<i64: 9, 128>}, {pipeline_mode = #tpu.pipeline_mode<synchronous>, transform_indices = @transform_2, window_bounds = array<i64: 8, 144>}, {pipeline_mode = #tpu.pipeline_mode<synchronous>, transform_indices = @transform_3, window_bounds = array<i64: 8, 1>}, {pipeline_mode = #tpu.pipeline_mode<synchronous>, transform_indices = @transform_4, window_bounds = array<i64: 4, 72>}, {pipeline_mode = #tpu.pipeline_mode<synchronous>, transform_indices = @transform_5, window_bounds = array<i64: 4, 1>}, {pipeline_mode = #tpu.pipeline_mode<synchronous>, transform_indices = @transform_6, window_bounds = array<i64: 256, 128>}, {pipeline_mode = #tpu.pipeline_mode<synchronous>, transform_indices = @transform_7, window_bounds = array<i64: 1, 128>}, {pipeline_mode = #tpu.pipeline_mode<synchronous>, transform_indices = @transform_8, window_bounds = array<i64: 128, 512>}, {pipeline_mode = #tpu.pipeline_mode<synchronous>, transform_indices = @transform_9, window_bounds = array<i64: 1, 512>}, {pipeline_mode = #tpu.pipeline_mode<synchronous>, transform_indices = @transform_10, window_bounds = array<i64: 128, 7>}, {pipeline_mode = #tpu.pipeline_mode<synchronous>, transform_indices = @transform_11, window_bounds = array<i64: 1, 7>}, {pipeline_mode = #tpu.pipeline_mode<synchronous>, transform_indices = @transform_12, window_bounds = array<i64: 2, 6>}, {pipeline_mode = #tpu.pipeline_mode<synchronous>, transform_indices = @transform_13, window_bounds = array<i64: 2, 1>}]} {
    %c0 = arith.constant 0 : index
    %c0_0 = arith.constant 0 : index
    %0 = vector.load %arg1[%c0, %c0_0] : memref<32x64xf32, #tpu.memory_space<vmem>>, vector<32x64xf32>
    %c0_1 = arith.constant 0 : index
    %c0_2 = arith.constant 0 : index
    %1 = vector.load %arg2[%c0_1, %c0_2] : memref<9x128xf32, #tpu.memory_space<vmem>>, vector<9x128xf32>
    %2 = vector.extract_strided_slice %0 {offsets = [0, 0], sizes = [16, 64], strides = [1, 1]} : vector<32x64xf32> to vector<16x64xf32>
    %3 = vector.extract_strided_slice %0 {offsets = [16, 0], sizes = [16, 64], strides = [1, 1]} : vector<32x64xf32> to vector<16x64xf32>
    %4 = tpu.concatenate %2, %3 in 1 : vector<16x64xf32>, vector<16x64xf32> -> vector<16x128xf32>
    %c9_i32 = arith.constant 9 : i32
    %5 = tpu.dynamic_rotate %4 by %c9_i32 dim 1 : vector<16x128xf32>, i32 -> vector<16x128xf32>
    %6 = vector.extract_strided_slice %1 {offsets = [0, 0], sizes = [1, 128], strides = [1, 1]} : vector<9x128xf32> to vector<1x128xf32>
    %7 = vector.broadcast %6 : vector<1x128xf32> to vector<16x128xf32>
    %8 = arith.mulf %5, %7 : vector<16x128xf32>
    %c8_i32 = arith.constant 8 : i32
    %9 = tpu.dynamic_rotate %4 by %c8_i32 dim 1 : vector<16x128xf32>, i32 -> vector<16x128xf32>
    %10 = vector.extract_strided_slice %1 {offsets = [1, 0], sizes = [1, 128], strides = [1, 1]} : vector<9x128xf32> to vector<1x128xf32>
    %11 = vector.broadcast %10 : vector<1x128xf32> to vector<16x128xf32>
    %12 = arith.mulf %9, %11 : vector<16x128xf32>
    %c7_i32 = arith.constant 7 : i32
    %13 = tpu.dynamic_rotate %4 by %c7_i32 dim 1 : vector<16x128xf32>, i32 -> vector<16x128xf32>
    %14 = vector.extract_strided_slice %1 {offsets = [2, 0], sizes = [1, 128], strides = [1, 1]} : vector<9x128xf32> to vector<1x128xf32>
    %15 = vector.broadcast %14 : vector<1x128xf32> to vector<16x128xf32>
    %16 = arith.mulf %13, %15 : vector<16x128xf32>
    %c1_i32 = arith.constant 1 : i32
    %17 = tpu.dynamic_rotate %4 by %c1_i32 dim 1 : vector<16x128xf32>, i32 -> vector<16x128xf32>
    %18 = vector.extract_strided_slice %1 {offsets = [3, 0], sizes = [1, 128], strides = [1, 1]} : vector<9x128xf32> to vector<1x128xf32>
    %19 = vector.broadcast %18 : vector<1x128xf32> to vector<16x128xf32>
    %20 = arith.mulf %17, %19 : vector<16x128xf32>
    %c127_i32 = arith.constant 127 : i32
    %21 = tpu.dynamic_rotate %4 by %c127_i32 dim 1 : vector<16x128xf32>, i32 -> vector<16x128xf32>
    %22 = vector.extract_strided_slice %1 {offsets = [5, 0], sizes = [1, 128], strides = [1, 1]} : vector<9x128xf32> to vector<1x128xf32>
    %23 = vector.broadcast %22 : vector<1x128xf32> to vector<16x128xf32>
    %24 = arith.mulf %21, %23 : vector<16x128xf32>
    %c121_i32 = arith.constant 121 : i32
    %25 = tpu.dynamic_rotate %4 by %c121_i32 dim 1 : vector<16x128xf32>, i32 -> vector<16x128xf32>
    %26 = vector.extract_strided_slice %1 {offsets = [6, 0], sizes = [1, 128], strides = [1, 1]} : vector<9x128xf32> to vector<1x128xf32>
    %27 = vector.broadcast %26 : vector<1x128xf32> to vector<16x128xf32>
    %28 = arith.mulf %25, %27 : vector<16x128xf32>
    %c120_i32 = arith.constant 120 : i32
    %29 = tpu.dynamic_rotate %4 by %c120_i32 dim 1 : vector<16x128xf32>, i32 -> vector<16x128xf32>
    %30 = vector.extract_strided_slice %1 {offsets = [7, 0], sizes = [1, 128], strides = [1, 1]} : vector<9x128xf32> to vector<1x128xf32>
    %31 = vector.broadcast %30 : vector<1x128xf32> to vector<16x128xf32>
    %32 = arith.mulf %29, %31 : vector<16x128xf32>
    %c119_i32 = arith.constant 119 : i32
    %33 = tpu.dynamic_rotate %4 by %c119_i32 dim 1 : vector<16x128xf32>, i32 -> vector<16x128xf32>
    %34 = vector.extract_strided_slice %1 {offsets = [8, 0], sizes = [1, 128], strides = [1, 1]} : vector<9x128xf32> to vector<1x128xf32>
    %35 = vector.broadcast %34 : vector<1x128xf32> to vector<16x128xf32>
    %36 = arith.mulf %33, %35 : vector<16x128xf32>
    %37 = tpu.concatenate %8, %12, %16, %20, %4, %24, %28, %32, %36 in 0 : vector<16x128xf32>, vector<16x128xf32>, vector<16x128xf32>, vector<16x128xf32>, vector<16x128xf32>, vector<16x128xf32>, vector<16x128xf32>, vector<16x128xf32>, vector<16x128xf32> -> vector<144x128xf32>
    %38 = arith.truncf %37 : vector<144x128xf32> to vector<144x128xbf16>
    %c0_3 = arith.constant 0 : index
    %c0_4 = arith.constant 0 : index
    %39 = vector.load %arg3[%c0_3, %c0_4] : memref<8x144xbf16, #tpu.memory_space<vmem>>, vector<8x144xbf16>
    %cst = arith.constant dense<0.000000e+00> : vector<8x128xf32>
    %40 = tpu.matmul %39, %38, %cst {dimension_numbers = #tpu.dot_dimension_numbers<[1], [0], [0], [1], [0, 0, 1, 1], [], []>} : vector<8x144xbf16>, vector<144x128xbf16>, vector<8x128xf32> -> vector<8x128xf32>
    %c0_5 = arith.constant 0 : index
    %c0_6 = arith.constant 0 : index
    %41 = vector.load %arg4[%c0_5, %c0_6] : memref<8x1xf32, #tpu.memory_space<vmem>>, vector<8x1xf32>
    %42 = vector.broadcast %41 : vector<8x1xf32> to vector<8x128xf32>
    %43 = arith.addf %40, %42 : vector<8x128xf32>
    %44 = arith.negf %43 : vector<8x128xf32>
    %45 = math.exp %44 : vector<8x128xf32>
    %cst_7 = arith.constant 1.000000e+00 : f32
    %46 = vector.broadcast %cst_7 : f32 to vector<8x128xf32>
    %47 = arith.addf %46, %45 : vector<8x128xf32>
    %48 = arith.divf %46, %47 : vector<8x128xf32>
    %49 = arith.mulf %43, %48 : vector<8x128xf32>
    %c9_i32_8 = arith.constant 9 : i32
    %50 = tpu.dynamic_rotate %49 by %c9_i32_8 dim 1 : vector<8x128xf32>, i32 -> vector<8x128xf32>
    %51 = vector.extract_strided_slice %1 {offsets = [0, 0], sizes = [1, 128], strides = [1, 1]} : vector<9x128xf32> to vector<1x128xf32>
    %52 = vector.broadcast %51 : vector<1x128xf32> to vector<8x128xf32>
    %53 = arith.mulf %50, %52 : vector<8x128xf32>
    %c8_i32_9 = arith.constant 8 : i32
    %54 = tpu.dynamic_rotate %49 by %c8_i32_9 dim 1 : vector<8x128xf32>, i32 -> vector<8x128xf32>
    %55 = vector.extract_strided_slice %1 {offsets = [1, 0], sizes = [1, 128], strides = [1, 1]} : vector<9x128xf32> to vector<1x128xf32>
    %56 = vector.broadcast %55 : vector<1x128xf32> to vector<8x128xf32>
    %57 = arith.mulf %54, %56 : vector<8x128xf32>
    %c7_i32_10 = arith.constant 7 : i32
    %58 = tpu.dynamic_rotate %49 by %c7_i32_10 dim 1 : vector<8x128xf32>, i32 -> vector<8x128xf32>
    %59 = vector.extract_strided_slice %1 {offsets = [2, 0], sizes = [1, 128], strides = [1, 1]} : vector<9x128xf32> to vector<1x128xf32>
    %60 = vector.broadcast %59 : vector<1x128xf32> to vector<8x128xf32>
    %61 = arith.mulf %58, %60 : vector<8x128xf32>
    %c1_i32_11 = arith.constant 1 : i32
    %62 = tpu.dynamic_rotate %49 by %c1_i32_11 dim 1 : vector<8x128xf32>, i32 -> vector<8x128xf32>
    %63 = vector.extract_strided_slice %1 {offsets = [3, 0], sizes = [1, 128], strides = [1, 1]} : vector<9x128xf32> to vector<1x128xf32>
    %64 = vector.broadcast %63 : vector<1x128xf32> to vector<8x128xf32>
    %65 = arith.mulf %62, %64 : vector<8x128xf32>
    %c127_i32_12 = arith.constant 127 : i32
    %66 = tpu.dynamic_rotate %49 by %c127_i32_12 dim 1 : vector<8x128xf32>, i32 -> vector<8x128xf32>
    %67 = vector.extract_strided_slice %1 {offsets = [5, 0], sizes = [1, 128], strides = [1, 1]} : vector<9x128xf32> to vector<1x128xf32>
    %68 = vector.broadcast %67 : vector<1x128xf32> to vector<8x128xf32>
    %69 = arith.mulf %66, %68 : vector<8x128xf32>
    %c121_i32_13 = arith.constant 121 : i32
    %70 = tpu.dynamic_rotate %49 by %c121_i32_13 dim 1 : vector<8x128xf32>, i32 -> vector<8x128xf32>
    %71 = vector.extract_strided_slice %1 {offsets = [6, 0], sizes = [1, 128], strides = [1, 1]} : vector<9x128xf32> to vector<1x128xf32>
    %72 = vector.broadcast %71 : vector<1x128xf32> to vector<8x128xf32>
    %73 = arith.mulf %70, %72 : vector<8x128xf32>
    %c120_i32_14 = arith.constant 120 : i32
    %74 = tpu.dynamic_rotate %49 by %c120_i32_14 dim 1 : vector<8x128xf32>, i32 -> vector<8x128xf32>
    %75 = vector.extract_strided_slice %1 {offsets = [7, 0], sizes = [1, 128], strides = [1, 1]} : vector<9x128xf32> to vector<1x128xf32>
    %76 = vector.broadcast %75 : vector<1x128xf32> to vector<8x128xf32>
    %77 = arith.mulf %74, %76 : vector<8x128xf32>
    %c119_i32_15 = arith.constant 119 : i32
    %78 = tpu.dynamic_rotate %49 by %c119_i32_15 dim 1 : vector<8x128xf32>, i32 -> vector<8x128xf32>
    %79 = vector.extract_strided_slice %1 {offsets = [8, 0], sizes = [1, 128], strides = [1, 1]} : vector<9x128xf32> to vector<1x128xf32>
    %80 = vector.broadcast %79 : vector<1x128xf32> to vector<8x128xf32>
    %81 = arith.mulf %78, %80 : vector<8x128xf32>
    %82 = tpu.concatenate %53, %57, %61, %65, %49, %69, %73, %77, %81 in 0 : vector<8x128xf32>, vector<8x128xf32>, vector<8x128xf32>, vector<8x128xf32>, vector<8x128xf32>, vector<8x128xf32>, vector<8x128xf32>, vector<8x128xf32>, vector<8x128xf32> -> vector<72x128xf32>
    %83 = arith.truncf %82 : vector<72x128xf32> to vector<72x128xbf16>
    %c0_16 = arith.constant 0 : index
    %c0_17 = arith.constant 0 : index
    %84 = vector.load %arg5[%c0_16, %c0_17] : memref<4x72xbf16, #tpu.memory_space<vmem>>, vector<4x72xbf16>
    %cst_18 = arith.constant dense<0.000000e+00> : vector<4x128xf32>
    %85 = tpu.matmul %84, %83, %cst_18 {dimension_numbers = #tpu.dot_dimension_numbers<[1], [0], [0], [1], [0, 0, 1, 1], [], []>} : vector<4x72xbf16>, vector<72x128xbf16>, vector<4x128xf32> -> vector<4x128xf32>
    %c0_19 = arith.constant 0 : index
    %c0_20 = arith.constant 0 : index
    %86 = vector.load %arg6[%c0_19, %c0_20] : memref<4x1xf32, #tpu.memory_space<vmem>>, vector<4x1xf32>
    %87 = vector.broadcast %86 : vector<4x1xf32> to vector<4x128xf32>
    %88 = arith.addf %85, %87 : vector<4x128xf32>
    %89 = arith.negf %88 : vector<4x128xf32>
    %90 = math.exp %89 : vector<4x128xf32>
    %cst_21 = arith.constant 1.000000e+00 : f32
    %91 = vector.broadcast %cst_21 : f32 to vector<4x128xf32>
    %92 = arith.addf %91, %90 : vector<4x128xf32>
    %93 = arith.divf %91, %92 : vector<4x128xf32>
    %94 = arith.mulf %88, %93 : vector<4x128xf32>
    %95 = vector.extract_strided_slice %94 {offsets = [0, 0], sizes = [1, 64], strides = [1, 1]} : vector<4x128xf32> to vector<1x64xf32>
    %96 = vector.extract_strided_slice %94 {offsets = [0, 64], sizes = [1, 64], strides = [1, 1]} : vector<4x128xf32> to vector<1x64xf32>
    %97 = tpu.concatenate %95, %96 in 0 : vector<1x64xf32>, vector<1x64xf32> -> vector<2x64xf32>
    %98 = vector.extract_strided_slice %94 {offsets = [1, 0], sizes = [1, 64], strides = [1, 1]} : vector<4x128xf32> to vector<1x64xf32>
    %99 = vector.extract_strided_slice %94 {offsets = [1, 64], sizes = [1, 64], strides = [1, 1]} : vector<4x128xf32> to vector<1x64xf32>
    %100 = tpu.concatenate %98, %99 in 0 : vector<1x64xf32>, vector<1x64xf32> -> vector<2x64xf32>
    %101 = vector.extract_strided_slice %94 {offsets = [2, 0], sizes = [1, 64], strides = [1, 1]} : vector<4x128xf32> to vector<1x64xf32>
    %102 = vector.extract_strided_slice %94 {offsets = [2, 64], sizes = [1, 64], strides = [1, 1]} : vector<4x128xf32> to vector<1x64xf32>
    %103 = tpu.concatenate %101, %102 in 0 : vector<1x64xf32>, vector<1x64xf32> -> vector<2x64xf32>
    %104 = vector.extract_strided_slice %94 {offsets = [3, 0], sizes = [1, 64], strides = [1, 1]} : vector<4x128xf32> to vector<1x64xf32>
    %105 = vector.extract_strided_slice %94 {offsets = [3, 64], sizes = [1, 64], strides = [1, 1]} : vector<4x128xf32> to vector<1x64xf32>
    %106 = tpu.concatenate %104, %105 in 0 : vector<1x64xf32>, vector<1x64xf32> -> vector<2x64xf32>
    %107 = tpu.concatenate %97, %100, %103, %106 in 1 : vector<2x64xf32>, vector<2x64xf32>, vector<2x64xf32>, vector<2x64xf32> -> vector<2x256xf32>
    %108 = arith.truncf %107 : vector<2x256xf32> to vector<2x256xbf16>
    %c0_22 = arith.constant 0 : index
    %c0_23 = arith.constant 0 : index
    %109 = vector.load %arg7[%c0_22, %c0_23] : memref<256x128xbf16, #tpu.memory_space<vmem>>, vector<256x128xbf16>
    %cst_24 = arith.constant dense<0.000000e+00> : vector<2x128xf32>
    %110 = tpu.matmul %108, %109, %cst_24 {dimension_numbers = #tpu.dot_dimension_numbers<[1], [0], [0], [1], [0, 0, 1, 1], [], []>} : vector<2x256xbf16>, vector<256x128xbf16>, vector<2x128xf32> -> vector<2x128xf32>
    %c0_25 = arith.constant 0 : index
    %c0_26 = arith.constant 0 : index
    %111 = vector.load %arg8[%c0_25, %c0_26] : memref<1x128xf32, #tpu.memory_space<vmem>>, vector<1x128xf32>
    %112 = vector.broadcast %111 : vector<1x128xf32> to vector<2x128xf32>
    %113 = arith.addf %110, %112 : vector<2x128xf32>
    %114 = arith.negf %113 : vector<2x128xf32>
    %115 = math.exp %114 : vector<2x128xf32>
    %cst_27 = arith.constant 1.000000e+00 : f32
    %116 = vector.broadcast %cst_27 : f32 to vector<2x128xf32>
    %117 = arith.addf %116, %115 : vector<2x128xf32>
    %118 = arith.divf %116, %117 : vector<2x128xf32>
    %119 = arith.mulf %113, %118 : vector<2x128xf32>
    %120 = arith.truncf %119 : vector<2x128xf32> to vector<2x128xbf16>
    %c0_28 = arith.constant 0 : index
    %c0_29 = arith.constant 0 : index
    %121 = vector.load %arg9[%c0_28, %c0_29] : memref<128x512xbf16, #tpu.memory_space<vmem>>, vector<128x512xbf16>
    %cst_30 = arith.constant dense<0.000000e+00> : vector<2x512xf32>
    %122 = tpu.matmul %120, %121, %cst_30 {dimension_numbers = #tpu.dot_dimension_numbers<[1], [0], [0], [1], [0, 0, 1, 1], [], []>} : vector<2x128xbf16>, vector<128x512xbf16>, vector<2x512xf32> -> vector<2x512xf32>
    %c0_31 = arith.constant 0 : index
    %c0_32 = arith.constant 0 : index
    %123 = vector.load %arg10[%c0_31, %c0_32] : memref<1x512xf32, #tpu.memory_space<vmem>>, vector<1x512xf32>
    %124 = vector.broadcast %123 : vector<1x512xf32> to vector<2x512xf32>
    %125 = arith.addf %122, %124 : vector<2x512xf32>
    %126 = vector.extract_strided_slice %125 {offsets = [0, 0], sizes = [2, 128], strides = [1, 1]} : vector<2x512xf32> to vector<2x128xf32>
    %127 = arith.negf %126 : vector<2x128xf32>
    %128 = math.exp %127 : vector<2x128xf32>
    %cst_33 = arith.constant 1.000000e+00 : f32
    %129 = vector.broadcast %cst_33 : f32 to vector<2x128xf32>
    %130 = arith.addf %129, %128 : vector<2x128xf32>
    %131 = arith.divf %129, %130 : vector<2x128xf32>
    %132 = vector.extract_strided_slice %125 {offsets = [0, 256], sizes = [2, 128], strides = [1, 1]} : vector<2x512xf32> to vector<2x128xf32>
    %133 = math.tanh %132 : vector<2x128xf32>
    %134 = vector.extract_strided_slice %125 {offsets = [0, 384], sizes = [2, 128], strides = [1, 1]} : vector<2x512xf32> to vector<2x128xf32>
    %135 = arith.negf %134 : vector<2x128xf32>
    %136 = math.exp %135 : vector<2x128xf32>
    %cst_34 = arith.constant 1.000000e+00 : f32
    %137 = vector.broadcast %cst_34 : f32 to vector<2x128xf32>
    %138 = arith.addf %137, %136 : vector<2x128xf32>
    %139 = arith.divf %137, %138 : vector<2x128xf32>
    %140 = arith.mulf %131, %133 : vector<2x128xf32>
    %141 = math.tanh %140 : vector<2x128xf32>
    %142 = arith.mulf %139, %141 : vector<2x128xf32>
    %143 = arith.truncf %142 : vector<2x128xf32> to vector<2x128xbf16>
    %c0_35 = arith.constant 0 : index
    %c0_36 = arith.constant 0 : index
    %144 = vector.load %arg11[%c0_35, %c0_36] : memref<128x7xbf16, #tpu.memory_space<vmem>>, vector<128x7xbf16>
    %cst_37 = arith.constant dense<0.000000e+00> : vector<2x7xf32>
    %145 = tpu.matmul %143, %144, %cst_37 {dimension_numbers = #tpu.dot_dimension_numbers<[1], [0], [0], [1], [0, 0, 1, 1], [], []>} : vector<2x128xbf16>, vector<128x7xbf16>, vector<2x7xf32> -> vector<2x7xf32>
    %c0_38 = arith.constant 0 : index
    %c0_39 = arith.constant 0 : index
    %146 = vector.load %arg12[%c0_38, %c0_39] : memref<1x7xf32, #tpu.memory_space<vmem>>, vector<1x7xf32>
    %147 = vector.broadcast %146 : vector<1x7xf32> to vector<2x7xf32>
    %148 = arith.addf %145, %147 : vector<2x7xf32>
    %149 = vector.extract_strided_slice %148 {offsets = [0, 0], sizes = [2, 6], strides = [1, 1]} : vector<2x7xf32> to vector<2x6xf32>
    %c0_40 = arith.constant 0 : index
    %c0_41 = arith.constant 0 : index
    %150 = vector.load %arg13[%c0_40, %c0_41] : memref<2x6xf32, #tpu.memory_space<vmem>>, vector<2x6xf32>
    tpu.vector_store %arg13[%c0_40, %c0_41], %149 {strides = array<i32>} : memref<2x6xf32, #tpu.memory_space<vmem>>, vector<2x6xf32>,
    %151 = vector.extract_strided_slice %148 {offsets = [0, 6], sizes = [2, 1], strides = [1, 1]} : vector<2x7xf32> to vector<2x1xf32>
    %c0_42 = arith.constant 0 : index
    %c0_43 = arith.constant 0 : index
    %152 = vector.load %arg14[%c0_42, %c0_43] : memref<2x1xf32, #tpu.memory_space<vmem>>, vector<2x1xf32>
    tpu.vector_store %arg14[%c0_42, %c0_43], %151 {strides = array<i32>} : memref<2x1xf32, #tpu.memory_space<vmem>>, vector<2x1xf32>,
    return
  }
  func.func @transform_0(%arg0: i32) -> (i32, i32) {
    %c0_i32 = arith.constant 0 : i32
    %c0_i32_0 = arith.constant 0 : i32
    %c0_i32_1 = arith.constant 0 : i32
    return %c0_i32, %c0_i32_0 : i32, i32
  }
  func.func @transform_1(%arg0: i32) -> (i32, i32) {
    %c0_i32 = arith.constant 0 : i32
    %c0_i32_0 = arith.constant 0 : i32
    %c0_i32_1 = arith.constant 0 : i32
    return %c0_i32, %c0_i32_0 : i32, i32
  }
  func.func @transform_2(%arg0: i32) -> (i32, i32) {
    %c0_i32 = arith.constant 0 : i32
    %c0_i32_0 = arith.constant 0 : i32
    %c0_i32_1 = arith.constant 0 : i32
    return %c0_i32, %c0_i32_0 : i32, i32
  }
  func.func @transform_3(%arg0: i32) -> (i32, i32) {
    %c0_i32 = arith.constant 0 : i32
    %c0_i32_0 = arith.constant 0 : i32
    %c0_i32_1 = arith.constant 0 : i32
    return %c0_i32, %c0_i32_0 : i32, i32
  }
  func.func @transform_4(%arg0: i32) -> (i32, i32) {
    %c0_i32 = arith.constant 0 : i32
    %c0_i32_0 = arith.constant 0 : i32
    %c0_i32_1 = arith.constant 0 : i32
    return %c0_i32, %c0_i32_0 : i32, i32
  }
  func.func @transform_5(%arg0: i32) -> (i32, i32) {
    %c0_i32 = arith.constant 0 : i32
    %c0_i32_0 = arith.constant 0 : i32
    %c0_i32_1 = arith.constant 0 : i32
    return %c0_i32, %c0_i32_0 : i32, i32
  }
  func.func @transform_6(%arg0: i32) -> (i32, i32) {
    %c0_i32 = arith.constant 0 : i32
    %c0_i32_0 = arith.constant 0 : i32
    %c0_i32_1 = arith.constant 0 : i32
    return %c0_i32, %c0_i32_0 : i32, i32
  }
  func.func @transform_7(%arg0: i32) -> (i32, i32) {
    %c0_i32 = arith.constant 0 : i32
    %c0_i32_0 = arith.constant 0 : i32
    %c0_i32_1 = arith.constant 0 : i32
    return %c0_i32, %c0_i32_0 : i32, i32
  }
  func.func @transform_8(%arg0: i32) -> (i32, i32) {
    %c0_i32 = arith.constant 0 : i32
    %c0_i32_0 = arith.constant 0 : i32
    %c0_i32_1 = arith.constant 0 : i32
    return %c0_i32, %c0_i32_0 : i32, i32
  }
  func.func @transform_9(%arg0: i32) -> (i32, i32) {
    %c0_i32 = arith.constant 0 : i32
    %c0_i32_0 = arith.constant 0 : i32
    %c0_i32_1 = arith.constant 0 : i32
    return %c0_i32, %c0_i32_0 : i32, i32
  }
  func.func @transform_10(%arg0: i32) -> (i32, i32) {
    %c0_i32 = arith.constant 0 : i32
    %c0_i32_0 = arith.constant 0 : i32
    %c0_i32_1 = arith.constant 0 : i32
    return %c0_i32, %c0_i32_0 : i32, i32
  }
  func.func @transform_11(%arg0: i32) -> (i32, i32) {
    %c0_i32 = arith.constant 0 : i32
    %c0_i32_0 = arith.constant 0 : i32
    %c0_i32_1 = arith.constant 0 : i32
    return %c0_i32, %c0_i32_0 : i32, i32
  }
  func.func @transform_12(%arg0: i32) -> (i32, i32) {
    %c0_i32 = arith.constant 0 : i32
    %c0_i32_0 = arith.constant 0 : i32
    %c0_i32_1 = arith.constant 0 : i32
    return %c0_i32, %c0_i32_0 : i32, i32
  }
  func.func @transform_13(%arg0: i32) -> (i32, i32) {
    %c0_i32 = arith.constant 0 : i32
    %c0_i32_0 = arith.constant 0 : i32
    %c0_i32_1 = arith.constant 0 : i32
    return %c0_i32, %c0_i32_0 : i32, i32
  }
}

</mosaic_0001>

<bundles_post_ra>
// kernel: actor_critic_forward.1
= control target key start
LH: loop header
LB: loop body
LE: loop exit
PB: predicated region body
PF: predicated region fallthrough
CT: control target
= control target key end

     0   :  { %s1261_s27 = smov 64   ;;  %s1716_s0 = inlined_call_operand.vmem [shape: f32[32,64], index: 0, kind: input, shape index: {}]   ;;  %s1717_s1 = inlined_call_operand.vmem [shape: f32[9,128], index: 1, kind: input, shape index: {}]   ;;  %s1718_s2 = inlined_call_operand.vmem [shape: bf16[8,144], index: 2, kind: input, shape index: {}]   ;;  %s1719_s3 = inlined_call_operand.vmem [shape: f32[8,1], index: 3, kind: input, shape index: {}]   ;;  %s1720_s4 = inlined_call_operand.vmem [shape: bf16[4,72], index: 4, kind: input, shape index: {}]   ;;  %s1721_s5 = inlined_call_operand.vmem [shape: f32[4,1], index: 5, kind: input, shape index: {}]   ;;  %s1722_s6 = inlined_call_operand.vmem [shape: bf16[256,128], index: 6, kind: input, shape index: {}]   ;;  %s1723_s7 = inlined_call_operand.vmem [shape: f32[1,128], index: 7, kind: input, shape index: {}]   ;;  %s1724_s8 = inlined_call_operand.vmem [shape: bf16[128,512], index: 8, kind: input, shape index: {}]   ;;  %s1725_s9 = inlined_call_operand.vmem [shape: f32[1,512], index: 9, kind: input, shape index: {}]   ;;  %s1726_s10 = inlined_call_operand.vmem [shape: bf16[128,7], index: 10, kind: input, shape index: {}]   ;;  %s1727_s11 = inlined_call_operand.vmem [shape: f32[1,7], index: 11, kind: input, shape index: {}]   ;;  %s1728_s12 = inlined_call_operand.hbm [shape: f32[2,6], index: 12, kind: output, shape index: {0}]   ;;  %s1729_s13 = inlined_call_operand.vmem [shape: f32[2,1], index: 13, kind: output, shape index: {1}]  }
   0x1   :  { %v47_v0 = vld [vmem:[%s1716_s0 + $0x10] sm:$0xff]  ;;  %v48_v1 = vld [vmem:[%s1716_s0 + $0x18] sm:$0xff] }
   0x2   :  { %53 = vrot.lane.b32.xlu0 %v47_v0, %s1261_s27 }
   0x6   :  { %55 = vrot.lane.b32.xlu0 %v48_v1, %s1261_s27 }
   0x7   :  { %19 = vsyncpa [#allocation3], 0  ;;  %v1262_v2 = vmov 0   ;;  %vm59_vm0 = vcmask 523264   ;;  %v45_v3 = vld [vmem:[%s1716_s0] sm:$0xff]  ;;  %s1263_s15 = smov 8   ;;  %v66_v13 = vlaneseq }
   0x8   :  { %168 = vmatprep.subr.bf16.mxu0 %v1262_v2  ;;  %1123 = vset.pattern.permute.xlu0 %v1262_v2  ;;  %s1264_s16 = smov 9   ;;  %v46_v6 = vld [vmem:[%s1716_s0 + $0x8] sm:$0xff]  ;;  %s1265_s19 = smov 7   ;;  %v1400_v10 = vld [vmem:[%s1718_s2] sm:$0xff]  ;;  %vm164_vm1 = vcmask 130048   ;;  %vm1272_vm2 = vmmov 0  }
   0x9   :  { %s1266_s20 = smov 1   ;;  %s1267_s0 = smov 127   ;;  %v972_v11 = vcombine.high %v1400_v10, %v1400_v10  ;;  %v152_v12 = vld [vmem:[%s1719_s3] sm:$0xff]  ;;  %v1411_v14 = vshrl.u32 %v66_v13, 7  ;;  %v970_v1 = vld [vmem:[%s1717_s1 + $0x8] ss:$0 sm:$0xff] }
   0xa   :  { %s1268_s21 = smov 121   ;;  %s1269_s22 = smov 120   ;;  %v49_v16 = vld [vmem:[%s1717_s1] sm:$0xff]  ;;  %vm255_vm3 = vcmask 1043456   ;;  %vm251_vm4 = vcmask 588800   ;;  %vm311_vm5 = vcmask 1040384  }
   0xb   :  { %s1270_s23 = smov 119   ;;  %973 = vmatprep.mubr.msk.bf16.mxu0 %vm164_vm1, %v972_v11  ;;  %v68_v15 = vsub.s32 0, %v1411_v14  ;;  %v78_v19 = vsub.s32 1, %v1411_v14  ;;  %v88_v25 = vsub.s32 2, %v1411_v14  ;;  %v98_v31 = vsub.s32 3, %v1411_v14  ;;  %s1273_s1 = smov [#allocation2]  }
   0xc   :  { %v108_v43 = vsub.s32 5, %v1411_v14  ;;  %v118_v48 = vsub.s32 6, %v1411_v14  ;;  %v128_v54 = vsub.s32 7, %v1411_v14  ;;  %v1029_v14 = vld [vmem:[%s1727_s11] ss:$0 sm:$0xff]  ;;  %s958_s14 = sshll.u32 %s1273_s1, 4  ;;  %s959_s14 = int_to_ptr.vmem [resolvable:$true] %s958_s14 }
   0xd   :  { %v1420_v20 = vrot.slane %v49_v16, %v68_v15  ;;  %v1422_v23 = vrot.slane %v49_v16, %v78_v19  ;;  %v1430_v30 = vrot.slane %v49_v16, %v88_v25  ;;  %v1438_v37 = vrot.slane %v49_v16, %v98_v31  ;;  %p1242_p1 = scmp.lt.s32.totalorder %s959_s14, %s959_s14 }
   0xe   :  { %v1446_v47 = vrot.slane %v49_v16, %v108_v43  ;;  %v1452_v53 = vrot.slane %v49_v16, %v118_v48  ;;  %v1461_v60 = vrot.slane %v49_v16, %v128_v54  ;;  %v244_v48 = vld [vmem:[%s1720_s4] sm:$0x3]  ;;  %vm944_vm6 = vcmask 41984  }
  0x74   :  { %v54_v4 = vpop.permute.xlu0 %53 }
  0x75   :  { %v1359_v5 = vsel %vm59_vm0, %v45_v3, %v54_v4 }
  0x76   :  { %72 = vrot.lane.b32.xlu0 %v1359_v5, %s1263_s15  ;;  %62 = vrot.lane.b32.xlu1 %v1359_v5, %s1264_s16 }
  0x78   :  { %v56_v7 = vpop.permute.xlu0 %55 }
  0x79   :  { %v1369_v8 = vsel %vm59_vm0, %v46_v6, %v56_v7 }
  0x7a   :  { %82 = vrot.lane.b32.xlu0 %v1359_v5, %s1265_s19  ;;  %64 = vrot.lane.b32.xlu1 %v1369_v8, %s1264_s16  ;;  %v146_v9 = vpack.c.bf16 %v1369_v8, %v1359_v5 }
  0x7e   :  { %92 = vrot.lane.b32.xlu0 %v1359_v5, %s1266_s20  ;;  %74 = vrot.lane.b32.xlu1 %v1369_v8, %s1263_s15 }
  0x82   :  { %102 = vrot.lane.b32.xlu0 %v1359_v5, %s1267_s0  ;;  %84 = vrot.lane.b32.xlu1 %v1369_v8, %s1265_s19 }
  0x86   :  { %112 = vrot.lane.b32.xlu0 %v1359_v5, %s1268_s21  ;;  %94 = vrot.lane.b32.xlu1 %v1369_v8, %s1266_s20 }
  0x8a   :  { %122 = vrot.lane.b32.xlu0 %v1359_v5, %s1269_s22  ;;  %104 = vrot.lane.b32.xlu1 %v1369_v8, %s1267_s0 }
  0x8e   :  { %132 = vrot.lane.b32.xlu0 %v1359_v5, %s1270_s23  ;;  %114 = vrot.lane.b32.xlu1 %v1369_v8, %s1268_s21 }
  0x92   :  { %124 = vrot.lane.b32.xlu1 %v1369_v8, %s1269_s22  ;;  %155 = vperm.xlu0 %1123, %v152_v12  }
  0x96   :  { %134 = vrot.lane.b32.xlu1 %v1369_v8, %s1270_s23  ;;  %v971_v8 = vcombine.low %v1400_v10, %v1400_v10 }
  0xe8   :  { %v73_v17 = vpop.permute.xlu0 %72  ;;  %v63_v18 = vpop.permute.xlu1 %62 }
  0xe9   :  { %v70_v24 = vmul.f32 %v1420_v20, %v63_v18  ;;  %v80_v29 = vmul.f32 %v1422_v23, %v73_v17 }
  0xec   :  { %v83_v21 = vpop.permute.xlu0 %82  ;;  %v65_v22 = vpop.permute.xlu1 %64 }
  0xed   :  { %v71_v26 = vmul.f32 %v1420_v20, %v65_v22  ;;  %v90_v36 = vmul.f32 %v1430_v30, %v83_v21  ;;  %v1271_v22 = vmov 0.0  }
  0xee   :  { %1075 = vmatprep.subr.bf16.mxu1 %v1271_v22  ;;  %1085 = vmatprep.mubr.msk.bf16.mxu1 %vm1272_vm2, %v1271_v22 }
  0xef   :  { %v142_v27 = vpack.c.bf16 %v71_v26, %v70_v24  ;;  %v245_v26 = vld [vmem:[%s1721_s5] sm:$0xf]  ;;  %s1274_s5 = smov 122  }
  0xf0   :  { %v75_v28 = vpop.permute.xlu1 %74  ;;  %v93_v33 = vpop.permute.xlu0 %92 }
  0xf1   :  { %v81_v32 = vmul.f32 %v1422_v23, %v75_v28  ;;  %169 = vmatpush1.bf16.msra.mxu0 %v142_v27  ;;  %v100_v42 = vmul.f32 %v1438_v37, %v93_v33 }
  0xf2   :  { %170 = vmatprep.subr.bf16.mxu0 %v1262_v2 }
  0xf3   :  { %v143_v34 = vpack.c.bf16 %v81_v32, %v80_v29 }
  0xf4   :  { %v85_v35 = vpop.permute.xlu1 %84  ;;  %v103_v40 = vpop.permute.xlu0 %102 }
  0xf5   :  { %v91_v38 = vmul.f32 %v1430_v30, %v85_v35  ;;  %171 = vmatpush1.bf16.msra.mxu0 %v143_v34  ;;  %v110_v52 = vmul.f32 %v1446_v47, %v103_v40 }
  0xf6   :  { %172 = vmatprep.subr.bf16.mxu0 %v1262_v2 }
  0xf7   :  { %v144_v39 = vpack.c.bf16 %v91_v38, %v90_v36 }
  0xf8   :  { %v95_v41 = vpop.permute.xlu1 %94  ;;  %v113_v49 = vpop.permute.xlu0 %112 }
  0xf9   :  { %v101_v44 = vmul.f32 %v1438_v37, %v95_v41  ;;  %173 = vmatpush1.bf16.msra.mxu0 %v144_v39  ;;  %v120_v59 = vmul.f32 %v1452_v53, %v113_v49 }
  0xfa   :  { %174 = vmatprep.subr.bf16.mxu0 %v1262_v2 }
  0xfb   :  { %v145_v45 = vpack.c.bf16 %v101_v44, %v100_v42 }
  0xfc   :  { %v105_v46 = vpop.permute.xlu1 %104  ;;  %v123_v57 = vpop.permute.xlu0 %122 }
  0xfd   :  { %175 = vmatpush1.bf16.msra.mxu0 %v145_v45  ;;  %v111_v50 = vmul.f32 %v1446_v47, %v105_v46  ;;  %v130_v0 = vmul.f32 %v1461_v60, %v123_v57 }
  0xfe   :  { %176 = vmatprep.subr.bf16.mxu0 %v1262_v2 }
  0xff   :  { %v147_v55 = vpack.c.bf16 %v111_v50, %v110_v52 }
 0x100   :  { %v115_v51 = vpop.permute.xlu1 %114  ;;  %v133_v3 = vpop.permute.xlu0 %132 }
 0x101   :  { %177 = vmatpush1.bf16.msra.mxu0 %v146_v9  ;;  %v121_v56 = vmul.f32 %v1452_v53, %v115_v51  ;;  %v140_v6 = vmul.f32 %v970_v1, %v133_v3 }
 0x102   :  { %178 = vmatprep.subr.bf16.mxu0 %v1262_v2 }
 0x103   :  { %v148_v61 = vpack.c.bf16 %v121_v56, %v120_v59  ;;  %v1142_v59 = vld [vmem:[%s1722_s6] sm:$0xff]  }
 0x104   :  { %v125_v58 = vpop.permute.xlu1 %124 }
 0x105   :  { %179 = vmatpush1.bf16.msra.mxu0 %v147_v55  ;;  %v131_v62 = vmul.f32 %v1461_v60, %v125_v58  ;;  %v1141_v58 = vld [vmem:[%s1722_s6 + $0x40] sm:$0xff]  }
 0x106   :  { %180 = vmatprep.subr.bf16.mxu0 %v1262_v2 }
 0x107   :  { %v149_v4 = vpack.c.bf16 %v131_v62, %v130_v0 }
 0x108   :  { %v135_v63 = vpop.permute.xlu1 %134 }
 0x109   :  { %181 = vmatpush1.bf16.msra.mxu0 %v148_v61  ;;  %v141_v5 = vmul.f32 %v970_v1, %v135_v63  ;;  %v1144_v63 = vld [vmem:[%s1722_s6 + $0x8] sm:$0xff]  }
 0x10a   :  { %182 = vmatprep.subr.bf16.mxu0 %v1262_v2 }
 0x10b   :  { %v150_v7 = vpack.c.bf16 %v141_v5, %v140_v6 }
 0x10d   :  { %183 = vmatpush1.bf16.msra.mxu0 %v149_v4  ;;  %v1145_v4 = vld [vmem:[%s1722_s6 + $0x50] sm:$0xff]  }
 0x10e   :  { %184 = vmatprep.subr.bf16.mxu0 %v1262_v2 }
 0x111   :  { %185 = vmatpush1.bf16.msra.mxu0 %v150_v7  ;;  %v156_v9 = vpop.permute.xlu0 %155  ;;  %v1146_v7 = vld [vmem:[%s1722_s6 + $0x10] sm:$0xff]  }
 0x114   :  { %201 = vmatmul.mubr.bf16.vlgmr.msra.gmra.mrb[0].mxu0 %v971_v8  ;;  %v1147_v8 = vld [vmem:[%s1722_s6 + $0x58] sm:$0xff]  }
 0x115   :  { %767 = vmatprep.mubr.bf16.mxu0 %v1262_v2 }
 0x1e7   :  { %v202_v11 = vpop.f32.mrb[0].mxu0 }
 0x1e8   :  { %v203_v12 = vadd.f32 %v202_v11, %v156_v9  ;;  %v204_v13 = vpop.f32.mrb[1].mxu0  ;;  %v1148_v9 = vld [vmem:[%s1722_s6 + $0x18] sm:$0xff]   ;;  %v1149_v11 = vld [vmem:[%s1722_s6 + $0x60] sm:$0xff]  }
 0x1e9   :  { %v205_v16 = vpop.f32.mrb[2].mxu0  ;;  %v1151_v13 = vld [vmem:[%s1722_s6 + $0x68] sm:$0xff]  }
 0x1ea   :  { %v974_v17 = vmul.f32 -1.442695, %v203_v12  ;;  %v206_v18 = vpop.f32.mrb[3].mxu0  ;;  %v1152_v16 = vld [vmem:[%s1722_s6 + $0x28] sm:$0xff]  }
 0x1eb   :  { %v1154_v18 = vld [vmem:[%s1722_s6 + $0x30] sm:$0xff]  }
 0x1ec   :  { %1213 = vpow2.f32 %v974_v17  ;;  %v1153_v17 = vld [vmem:[%s1722_s6 + $0x70] sm:$0xff]  }
 0x1f6   :  { %v1214_v19 = vpop.eup %1213 }
 0x1f7   :  { %v211_v21 = vadd.f32 1.0, %v1214_v19  ;;  %v1155_v19 = vld [vmem:[%s1722_s6 + $0x78] sm:$0xff]  }
 0x1f9   :  { %1215 = vrcp.f32 %v211_v21  ;;  %v1156_v21 = vld [vmem:[%s1722_s6 + $0x38] sm:$0xff]  }
 0x203   :  { %v1216_v24 = vpop.eup %1215 }
 0x204   :  { %v214_v10 = vmul.f32 %v1216_v24, %v203_v12  ;;  %v1150_v12 = vld [vmem:[%s1722_s6 + $0x20] sm:$0xff]  }
 0x206   :  { %221 = vrot.lane.b32.xlu0 %v214_v10, %s1265_s19  ;;  %215 = vrot.lane.b32.xlu1 %v214_v10, %s1264_s16 }
 0x20a   :  { %227 = vrot.lane.b32.xlu0 %v214_v10, %s1267_s0  ;;  %218 = vrot.lane.b32.xlu1 %v214_v10, %s1263_s15  ;;  %s1237_s15 = scalar_lea.vmem %s959_s14, 32 }
 0x20b   :  { %p1238_p0 = scmp.ne.s32.totalorder %s959_s14, %s1237_s15  ;;  %p1243_p2 = scmp.lt.s32.totalorder %s1237_s15, %s1237_s15 }
 0x20d   :  { %p1244_p3 = por %p1243_p2, %p1242_p1 }
 0x20e   :  { %233 = vrot.lane.b32.xlu0 %v214_v10, %s1269_s22  ;;  %224 = vrot.lane.b32.xlu1 %v214_v10, %s1266_s20 }
 0x20f   :  { %p1245_p4 = pnand %p1244_p3, %p1238_p0 }
 0x212   :  { %248 = vperm.xlu0 %1123, %v245_v26   ;;  %230 = vrot.lane.b32.xlu1 %v214_v10, %s1268_s21 }
 0x216   :  { %236 = vrot.lane.b32.xlu1 %v214_v10, %s1270_s23 }
 0x278   :  { %v216_v27 = vpop.permute.xlu1 %215  ;;  %v222_v28 = vpop.permute.xlu0 %221 }
 0x279   :  { %v217_v32 = vmul.f32 %v216_v27, %v1420_v20  ;;  %v223_v38 = vmul.f32 %v222_v28, %v1430_v30 }
 0x27c   :  { %v219_v29 = vpop.permute.xlu1 %218  ;;  %v228_v35 = vpop.permute.xlu0 %227 }
 0x27d   :  { %v220_v33 = vmul.f32 %v219_v29, %v1422_v23  ;;  %v229_v40 = vmul.f32 %v228_v35, %v1446_v47 }
 0x27f   :  { %v239_v34 = vpack.c.bf16 %v220_v33, %v217_v32  ;;  %v241_v20 = vpack.c.bf16 %v229_v40, %v214_v10 }
 0x280   :  { %v225_v36 = vpop.permute.xlu1 %224  ;;  %v234_v43 = vpop.permute.xlu0 %233 }
 0x281   :  { %v226_v39 = vmul.f32 %v225_v36, %v1438_v37  ;;  %1076 = vmatpush3.bf16.msra.mxu1 %v239_v34  ;;  %v235_v45 = vmul.f32 %v234_v43, %v1461_v60  ;;  %v1143_v60 = vld [vmem:[%s1722_s6 + $0x48] sm:$0xff]  }
 0x282   :  { %1077 = vmatprep.subr.bf16.mxu1 %v1271_v22 }
 0x283   :  { %v240_v41 = vpack.c.bf16 %v226_v39, %v223_v38 }
 0x284   :  { %v231_v42 = vpop.permute.xlu1 %230 }
 0x285   :  { %1078 = vmatpush3.bf16.msra.mxu1 %v240_v41  ;;  %v232_v23 = vmul.f32 %v231_v42, %v1452_v53 }
 0x286   :  { %1079 = vmatprep.subr.bf16.mxu1 %v1271_v22 }
 0x287   :  { %v242_v37 = vpack.c.bf16 %v235_v45, %v232_v23  ;;  %v1162_v45 = vld [vmem:[%s1724_s8 + $0xc] ss:$16 sps:$4 sm:$0xff]  }
 0x288   :  { %v237_v44 = vpop.permute.xlu1 %236 }
 0x289   :  { %v238_v30 = vmul.f32 %v970_v1, %v237_v44  ;;  %1080 = vmatpush3.bf16.msra.mxu1 %v241_v20  ;;  %v1159_v44 = vld [vmem:[%s1724_s8 + $0x4] ss:$16 sps:$4 sm:$0xff]  }
 0x28a   :  { %1081 = vmatprep.subr.bf16.mxu1 %v1271_v22  ;;  %735 = vmatprep.subr.bf16.mxu0 %v1159_v44 }
 0x28b   :  { %v243_v46 = vpack.c.bf16 %v238_v30, %v238_v30  ;;  %v1157_v30 = vld [vmem:[%s1724_s8] ss:$16 sps:$4 sm:$0xff]  }
 0x28c   :  { %736 = vmatpush1.bf16.msra.mxu0 %v1157_v30 }
 0x28d   :  { %1082 = vmatpush3.bf16.msra.mxu1 %v242_v37  ;;  %v257_v47 = vsel %vm255_vm3, %v243_v46, 0  ;;  %v1160_v37 = vld [vmem:[%s1724_s8 + $0x8] ss:$16 sps:$4 sm:$0xff]   ;;  %v1168_v46 = vld [vmem:[%s1724_s8 + $0x2c] ss:$16 sps:$4 sm:$0xff]  }
 0x28e   :  { %1083 = vmatprep.subr.bf16.mxu1 %v1271_v22 }
 0x291   :  { %1084 = vmatpush3.bf16.msra.mxu1 %v257_v47  ;;  %v249_v49 = vpop.permute.xlu0 %248  ;;  %v1163_v47 = vld [vmem:[%s1724_s8 + $0x20] ss:$16 sps:$4 sm:$0xff]  }
 0x292   :  { %1044 = vmatprep.subr.bf16.mxu1 %v1141_v58  ;;  %v1186_v58 = vld [vmem:[%s1724_s8 + $0x8c] ss:$16 sps:$4 sm:$0xff]  }
 0x294   :  { %1086 = vmatmul.mubr.msk.bf16.vlgmr.msra.gmra.mrb[0].mxu1 %vm251_vm4, %v244_v48  ;;  %v1166_v48 = vld [vmem:[%s1724_s8 + $0x28] ss:$16 sps:$4 sm:$0xff]  }
 0x295   :  { %1045 = vmatpush3.bf16.msra.mxu1 %v1142_v59  ;;  %v1181_v59 = vld [vmem:[%s1724_s8 + $0x80] ss:$16 sps:$4 sm:$0xff]  }
 0x296   :  { %1046 = vmatprep.subr.bf16.mxu1 %v1143_v60  ;;  %v1184_v60 = vld [vmem:[%s1724_s8 + $0x88] ss:$16 sps:$4 sm:$0xff]  }
 0x299   :  { %1047 = vmatpush3.bf16.msra.mxu1 %v1144_v63  ;;  %v1187_v63 = vld [vmem:[%s1724_s8 + $0xa0] ss:$16 sps:$4 sm:$0xff]  }
 0x29a   :  { %1048 = vmatprep.subr.bf16.mxu1 %v1145_v4  ;;  %v1193_v4 = vld [vmem:[%s1724_s8 + $0xc0] ss:$16 sps:$4 sm:$0xff]  }
 0x29d   :  { %1049 = vmatpush3.bf16.msra.mxu1 %v1146_v7  ;;  %v1204_v7 = vld [vmem:[%s1724_s8 + $0xec] ss:$16 sps:$4 sm:$0xff]  }
 0x29e   :  { %1050 = vmatprep.subr.bf16.mxu1 %v1147_v8  ;;  %v1199_v8 = vld [vmem:[%s1724_s8 + $0xe0] ss:$16 sps:$4 sm:$0xff]  }
 0x2a1   :  { %1051 = vmatpush3.bf16.msra.mxu1 %v1148_v9  ;;  %v1202_v9 = vld [vmem:[%s1724_s8 + $0xe8] ss:$16 sps:$4 sm:$0xff]  }
 0x2a2   :  { %1052 = vmatprep.subr.bf16.mxu1 %v1149_v11 }
 0x2a5   :  { %1053 = vmatpush3.bf16.msra.mxu1 %v1150_v12  ;;  %v977_v12 = vld [vmem:[%s1723_s7] ss:$0 sm:$0xff] }
 0x2a6   :  { %1054 = vmatprep.subr.bf16.mxu1 %v1151_v13 }
 0x2a9   :  { %1055 = vmatpush3.bf16.msra.mxu1 %v1152_v16 }
 0x2aa   :  { %1056 = vmatprep.subr.bf16.mxu1 %v1153_v17 }
 0x2ad   :  { %1057 = vmatpush3.bf16.msra.mxu1 %v1154_v18 }
 0x2ae   :  { %1058 = vmatprep.subr.bf16.mxu1 %v1155_v19 }
 0x2b1   :  { %1059 = vmatpush3.bf16.msra.mxu1 %v1156_v21 }
 0x2b2   :  { %775 = vmatprep.subr.bf16.mxu1 %v1162_v45 }
 0x367   :  { %v293_v50 = vpop.f32.mrb[0].mxu1 }
 0x368   :  { %v294_v51 = vadd.f32 %v293_v50, %v249_v49  ;;  %v1087_v52 = vpop.f32.mrb[1].mxu1  ;;  %v1171_v49 = vld [vmem:[%s1724_s8 + $0x44] ss:$16 sps:$4 sm:$0xff]   ;;  %v1174_v50 = vld [vmem:[%s1724_s8 + $0x4c] ss:$16 sps:$4 sm:$0xff]  }
 0x369   :  { %v296_v53 = vpop.f32.mrb[2].mxu1  ;;  %v1172_v52 = vld [vmem:[%s1724_s8 + $0x48] ss:$16 sps:$4 sm:$0xff]  }
 0x36a   :  { %v976_v54 = vmul.f32 -1.442695, %v294_v51  ;;  %v1088_v55 = vpop.f32.mrb[3].mxu1  ;;  %v1177_v53 = vld [vmem:[%s1724_s8 + $0x64] ss:$16 sps:$4 sm:$0xff]  }
 0x36b   :  { %v1175_v55 = vld [vmem:[%s1724_s8 + $0x60] ss:$16 sps:$4 sm:$0xff]  }
 0x36c   :  { %1217 = vpow2.f32 %v976_v54  ;;  %v1180_v54 = vld [vmem:[%s1724_s8 + $0x6c] ss:$16 sps:$4 sm:$0xff]  }
 0x376   :  { %v1218_v56 = vpop.eup %1217 }
 0x377   :  { %v302_v57 = vadd.f32 1.0, %v1218_v56  ;;  %v1178_v56 = vld [vmem:[%s1724_s8 + $0x68] ss:$16 sps:$4 sm:$0xff]  }
 0x379   :  { %1219 = vrcp.f32 %v302_v57  ;;  %v1183_v57 = vld [vmem:[%s1724_s8 + $0x84] ss:$16 sps:$4 sm:$0xff]  }
 0x383   :  { %v1220_v61 = vpop.eup %1219 }
 0x384   :  { %v305_v62 = vmul.f32 %v1220_v61, %v294_v51  ;;  %v1169_v51 = vld [vmem:[%s1724_s8 + $0x40] ss:$16 sps:$4 sm:$0xff]   ;;  %v1189_v61 = vld [vmem:[%s1724_s8 + $0xa4] ss:$16 sps:$4 sm:$0xff]  }
 0x386   :  { %v319_v0 = vrot.slane %v305_v62, 2  ;;  %v307_v1 = vrot.slane %v305_v62, 7  ;;  %v313_v3 = vrot.slane %v305_v62, 1  ;;  %v325_v27 = vrot.slane %v305_v62, 3 }
 0x388   :  { %v1124_v5 = vpack.i.bf16 %v305_v62, %v319_v0  ;;  %v1129_v6 = vpack.i.bf16 %v307_v1, %v313_v3  ;;  %v1195_v1 = vld [vmem:[%s1724_s8 + $0xc4] ss:$16 sps:$4 sm:$0xff]  }
 0x38a   :  { %1125 = vrot.lane.b32.xlu1 %v1124_v5, %s1261_s27  ;;  %1130 = vrot.lane.b32.xlu0 %v1129_v6, %s1261_s27  ;;  %v1196_v5 = vld [vmem:[%s1724_s8 + $0xc8] ss:$16 sps:$4 sm:$0xff]   ;;  %v1201_v6 = vld [vmem:[%s1724_s8 + $0xe4] ss:$16 sps:$4 sm:$0xff]  }
 0x3fc   :  { %v1126_v24 = vpop.permute.xlu1 %1125  ;;  %v1131_v33 = vpop.permute.xlu0 %1130 }
 0x3fd   :  { %v1128_v10 = vunpack.i.h.bf16 %v1126_v24  ;;  %v1127_v26 = vunpack.i.l.bf16 %v1126_v24  ;;  %v1133_v34 = vunpack.i.h.bf16 %v1131_v33  ;;  %v1132_v35 = vunpack.i.l.bf16 %v1131_v33  ;;  %v1207_v33 = vld [vmem:[%s1726_s10 + $0x10] sm:$0xff]  }
 0x3ff   :  { %v318_v28 = vsel %vm311_vm5, %v313_v3, %v1128_v10  ;;  %v330_v29 = vsel %vm311_vm5, %v325_v27, %v1127_v26  ;;  %v312_v40 = vsel %vm311_vm5, %v305_v62, %v1133_v34  ;;  %v324_v41 = vsel %vm311_vm5, %v319_v0, %v1132_v35  ;;  %v1192_v62 = vld [vmem:[%s1724_s8 + $0xac] ss:$16 sps:$4 sm:$0xff]   ;;  %v1190_v0 = vld [vmem:[%s1724_s8 + $0xa8] ss:$16 sps:$4 sm:$0xff]   ;;  %v1209_v35 = vld [vmem:[%s1726_s10 + $0x20] sm:$0xff]  }
 0x400   :  { %v1134_v32 = vpack.i.bf16 %v318_v28, %v330_v29  ;;  %v1198_v3 = vld [vmem:[%s1724_s8 + $0xcc] ss:$16 sps:$4 sm:$0xff]   ;;  %v1205_v29 = vld [vmem:[%s1726_s10] sm:$0xff]  }
 0x401   :  { %v1208_v34 = vld [vmem:[%s1726_s10 + $0x18] sm:$0xff]  }
 0x402   :  { %1135 = vrot.lane.b32.xlu1 %v1134_v32, %s1261_s27  ;;  %v1206_v32 = vld [vmem:[%s1726_s10 + $0x8] sm:$0xff]  }
 0x474   :  { %v1136_v36 = vpop.permute.xlu1 %1135 }
 0x475   :  { %v1138_v38 = vunpack.i.h.bf16 %v1136_v36  ;;  %v1137_v39 = vunpack.i.l.bf16 %v1136_v36  ;;  %v1210_v36 = vld [vmem:[%s1726_s10 + $0x28] sm:$0xff]  }
 0x477   :  { %v339_v42 = vsel %vm59_vm0, %v312_v40, %v1138_v38  ;;  %v340_v43 = vsel %vm59_vm0, %v324_v41, %v1137_v39  ;;  %v1211_v38 = vld [vmem:[%s1726_s10 + $0x30] sm:$0xff]   ;;  %v1212_v39 = vld [vmem:[%s1726_s10 + $0x38] sm:$0xff]   ;;  %v558_v40 = vld [vmem:[%s1725_s9] sm:$0xf] }
 0x478   :  { %v341_v20 = vpack.c.bf16 %v339_v42, %v339_v42  ;;  %v342_v23 = vpack.c.bf16 %v340_v43, %v340_v43  ;;  %v563_v41 = vrot.slane %v558_v40, %v68_v15  ;;  %v571_v44 = vrot.slane %v558_v40, %v98_v31 }
 0x47a   :  { %510 = vmatprep.mubr.bf16.mxu1 %v342_v23 }
 0x47b   :  { %511 = vmatmul.mubr.bf16.vlgmr.msra.gmra.mrb[4].mxu1 %v341_v20 }
 0x47c   :  { %807 = vmatprep.mubr.bf16.mxu1 %v1262_v2  ;;  %776 = vmatpush1.bf16.msra.mxu1 %v1160_v37  ;;  %v1165_v2 = vld [vmem:[%s1724_s8 + $0x24] ss:$16 sps:$4 sm:$0xff]  }
 0x47d   :  { %737 = vmatprep.subr.bf16.mxu0 %v1165_v2  ;;  %777 = vmatprep.subr.bf16.mxu1 %v1168_v46 }
 0x47e   :  { %738 = vmatpush1.bf16.msra.mxu0 %v1163_v47 }
 0x47f   :  { %739 = vmatprep.subr.bf16.mxu0 %v1171_v49 }
 0x480   :  { %778 = vmatpush1.bf16.msra.mxu1 %v1166_v48  ;;  %v567_v48 = vrot.slane %v558_v40, %v88_v25 }
 0x481   :  { %779 = vmatprep.subr.bf16.mxu1 %v1174_v50 }
 0x482   :  { %740 = vmatpush1.bf16.msra.mxu0 %v1169_v51 }
 0x483   :  { %741 = vmatprep.subr.bf16.mxu0 %v1177_v53 }
 0x484   :  { %780 = vmatpush1.bf16.msra.mxu1 %v1172_v52 }
 0x485   :  { %781 = vmatprep.subr.bf16.mxu1 %v1180_v54 }
 0x486   :  { %742 = vmatpush1.bf16.msra.mxu0 %v1175_v55 }
 0x487   :  { %743 = vmatprep.subr.bf16.mxu0 %v1183_v57 }
 0x488   :  { %782 = vmatpush1.bf16.msra.mxu1 %v1178_v56 }
 0x489   :  { %783 = vmatprep.subr.bf16.mxu1 %v1186_v58 }
 0x48a   :  { %744 = vmatpush1.bf16.msra.mxu0 %v1181_v59 }
 0x48b   :  { %745 = vmatprep.subr.bf16.mxu0 %v1189_v61 }
 0x48c   :  { %784 = vmatpush1.bf16.msra.mxu1 %v1184_v60 }
 0x48d   :  { %785 = vmatprep.subr.bf16.mxu1 %v1192_v62 }
 0x48e   :  { %746 = vmatpush1.bf16.msra.mxu0 %v1187_v63 }
 0x48f   :  { %747 = vmatprep.subr.bf16.mxu0 %v1195_v1 }
 0x490   :  { %786 = vmatpush1.bf16.msra.mxu1 %v1190_v0 }
 0x491   :  { %787 = vmatprep.subr.bf16.mxu1 %v1198_v3 }
 0x492   :  { %748 = vmatpush1.bf16.msra.mxu0 %v1193_v4 }
 0x493   :  { %749 = vmatprep.subr.bf16.mxu0 %v1201_v6 }
 0x494   :  { %788 = vmatpush1.bf16.msra.mxu1 %v1196_v5 }
 0x495   :  { %789 = vmatprep.subr.bf16.mxu1 %v1204_v7 }
 0x496   :  { %750 = vmatpush1.bf16.msra.mxu0 %v1199_v8 }
 0x497   :  { %1089 = vmatprep.subr.bf16.mxu0 %v1271_v22 }
 0x498   :  { %790 = vmatpush1.bf16.msra.mxu1 %v1202_v9 }
 0x54e   :  { %v1060_v11 = vpop.f32.mrb[4].mxu1 }
 0x54f   :  { %v1061_v13 = vpop.f32.mrb[5].mxu1 }
 0x550   :  { %v1062_v16 = vadd.f32 %v1061_v13, %v1060_v11  ;;  %v1063_v17 = vpop.f32.mrb[6].mxu1 }
 0x551   :  { %v1064_v18 = vpop.f32.mrb[7].mxu1 }
 0x552   :  { %v513_v19 = vadd.f32 %v1062_v16, %v977_v12 }
 0x554   :  { %v994_v21 = vmul.f32 -1.442695, %v513_v19 }
 0x556   :  { %1221 = vpow2.f32 %v994_v21 }
 0x560   :  { %v1222_v24 = vpop.eup %1221 }
 0x561   :  { %v521_v10 = vadd.f32 1.0, %v1222_v24 }
 0x563   :  { %1223 = vrcp.f32 %v521_v10 }
 0x56d   :  { %v1224_v26 = vpop.eup %1223 }
 0x56e   :  { %v524_v27 = vmul.f32 %v1224_v26, %v513_v19 }
 0x570   :  { %v525_v28 = vpack.c.bf16 %v524_v27, %v524_v27 }
 0x572   :  { %768 = vmatmul.mubr.bf16.vlgmr.msra.gmra.mrb[4].mxu0 %v525_v28  ;;  %808 = vmatmul.mubr.bf16.vlgmr.msra.gmra.mrb[8].mxu1 %v525_v28 }
 0x573   :  { %1105 = vmatprep.mubr.msk.bf16.mxu0 %vm1272_vm2, %v1271_v22  ;;  %1090 = vmatpush3.bf16.msra.mxu0 %v1205_v29 }
 0x574   :  { %1091 = vmatprep.subr.bf16.mxu0 %v1271_v22 }
 0x577   :  { %1092 = vmatpush3.bf16.msra.mxu0 %v1206_v32 }
 0x578   :  { %1093 = vmatprep.subr.bf16.mxu0 %v1271_v22 }
 0x57b   :  { %1094 = vmatpush3.bf16.msra.mxu0 %v1207_v33 }
 0x57c   :  { %1095 = vmatprep.subr.bf16.mxu0 %v1271_v22 }
 0x57f   :  { %1096 = vmatpush3.bf16.msra.mxu0 %v1208_v34 }
 0x580   :  { %1097 = vmatprep.subr.bf16.mxu0 %v1271_v22 }
 0x583   :  { %1098 = vmatpush3.bf16.msra.mxu0 %v1209_v35 }
 0x584   :  { %1099 = vmatprep.subr.bf16.mxu0 %v1271_v22 }
 0x587   :  { %1100 = vmatpush3.bf16.msra.mxu0 %v1210_v36 }
 0x588   :  { %1101 = vmatprep.subr.bf16.mxu0 %v1271_v22 }
 0x58b   :  { %1102 = vmatpush3.bf16.msra.mxu0 %v1211_v38 }
 0x58c   :  { %1103 = vmatprep.subr.bf16.mxu0 %v1271_v22 }
 0x58f   :  { %1104 = vmatpush3.bf16.msra.mxu0 %v1212_v39 }
 0x645   :  { %v769_v42 = vpop.f32.mrb[4].mxu0  ;;  %v809_v43 = vpop.f32.mrb[8].mxu1 }
 0x646   :  { %v770_v20 = vadd.f32 %v769_v42, %v563_v41  ;;  %v771_v23 = vpop.f32.mrb[5].mxu0  ;;  %v811_v45 = vpop.f32.mrb[9].mxu1  ;;  %v810_v15 = vadd.f32 %v809_v43, %v567_v48 }
 0x647   :  { %v772_v30 = vpop.f32.mrb[6].mxu0  ;;  %v813_v37 = vpop.f32.mrb[10].mxu1  ;;  %v812_v47 = vadd.f32 %v811_v45, %v571_v44 }
 0x648   :  { %v1027_v2 = vmul.f32 -1.442695, %v770_v20  ;;  %v773_v22 = vpop.f32.mrb[7].mxu0  ;;  %v814_v46 = vpop.f32.mrb[11].mxu1 }
 0x649   :  { %v1028_v49 = vmul.f32 -1.442695, %v812_v47 }
 0x64a   :  { %1225 = vpow2.f32 %v1027_v2 }
 0x64b   :  { %1227 = vpow2.f32 %v1028_v49 }
 0x64c   :  { %1229 = vtanh.f32 %v810_v15 }
 0x654   :  { %v1226_v50 = vpop.eup %1225 }
 0x655   :  { %v819_v51 = vadd.f32 1.0, %v1226_v50  ;;  %v1228_v52 = vpop.eup %1227 }
 0x656   :  { %v826_v31 = vadd.f32 1.0, %v1228_v52  ;;  %v1230_v53 = vpop.eup %1229 }
 0x657   :  { %1231 = vrcp.f32 %v819_v51 }
 0x658   :  { %1233 = vrcp.f32 %v826_v31 }
 0x661   :  { %v1232_v54 = vpop.eup %1231 }
 0x662   :  { %v829_v55 = vmul.f32 %v1232_v54, %v1230_v53  ;;  %v1234_v56 = vpop.eup %1233 }
 0x664   :  { %1235 = vtanh.f32 %v829_v55 }
 0x66e   :  { %v1236_v57 = vpop.eup %1235 }
 0x66f   :  { %v831_v58 = vmul.f32 %v1236_v57, %v1234_v56 }
 0x671   :  { %v832_v59 = vpack.c.bf16 %v831_v58, %v831_v58 }
 0x673   :  { %1106 = vmatmul.mubr.bf16.vlgmr.msra.gmra.mrb[8].mxu0 %v832_v59 }
 0x746   :  { %v938_v25 = vpop.f32.mrb[8].mxu0 }
 0x747   :  { %v939_v60 = vadd.f32 %v1029_v14, %v938_v25  ;;  %v1107_v61 = vpop.f32.mrb[9].mxu0 }
 0x748   :  { %v941_v62 = vpop.f32.mrb[10].mxu0 }
 0x749   :  { %947 = vrot.lane.b32.xlu0 %v939_v60, %s1274_s5  ;;  %v1108_v63 = vpop.f32.mrb[11].mxu0  ;;  %945 = vst.msk [vmem:[#allocation2] sm:$0x3] %vm944_vm6, %v939_v60 }
 0x74a   :  { %1248 = shalt.err (!%p1245_p4)
}
 0x74b   :  { %s1249_s17 = scalar_lea.hbm %s1728_s12, 32 }
 0x74c   :  { %p1250_p5 = scmp.ne.s32.totalorder %s1728_s12, %s1249_s17  ;;  %p1253_p6 = scmp.lt.u32.totalorder %s1249_s17, %s1728_s12 }
 0x74e   :  { %p1255_p7 = pnand %p1253_p6, %p1250_p5 }
 0x750   :  { %1258 = shalt.err (!%p1255_p7)
}
 0x751   :  { %961 = dma.vmem_to_hbm [thread:$0]  %s959_s14, 32, %s1728_s12, [#allocation3]   ;;  %vm950_vm7 = vcmask 1024  }
 0x7bb   :  { %v948_v0 = vpop.permute.xlu0 %947 }
 0x7bc   :  { %951 = vst.msk [vmem:[%s1729_s13] sm:$0x3] %vm950_vm7, %v948_v0 }
 0x7bd   :  { %1259 = dma.done.wait [#allocation3], 32  }
 0x7be   :  { %1260 = vsyncadd [#allocation3], 4294967264 }
 0x7bf   :  { %969 = vsyncpa [#allocation3], 1 }

</bundles_post_ra>
